<compile_context>
chip_gen: v5e
topology: v5e:2x2
jax: 0.10.0
libtpu: 0.0.40
codegen_flags: <defaults>
</compile_context>

<pallas_src>
import functools
import math

import jax
import jax.numpy as jnp
from jax.experimental import pallas as pl
from jax.experimental.pallas import tpu as pltpu

HIDDEN = 64          # hidden width of the PyTorch module
LANE = 128           # TPU lane width (pad weight/output minor dims to this)
SUBLANE = 8          # sublane alignment for the batch dim
NEG_INF = -1e30      # finite "minus infinity" used to mask padded batch rows


def _round_up(n, m):
    return ((n + m - 1) // m) * m


# ---------------------------------------------------------------------------
# Fused kernel: probs = softmax_dim0( ReLU(ReLU(x@W1+b1)@W2+b2)@W3 + b3 ).
# Single grid step (grid=()), everything resident in VMEM.  Matmul operands are
# bf16 (MXU peak path) with f32 accumulation; bias add / ReLU / softmax in f32.
# ---------------------------------------------------------------------------
def deep_cem_kernel(x_ref, w1_ref, b1_ref, w2_ref, b2_ref, w3_ref, b3_ref, o_ref,
                    *, valid_rows, padded_rows):
    x = x_ref[...]                                                    # (B_pad, S) bf16
    h1 = jnp.dot(x, w1_ref[...], preferred_element_type=jnp.float32) + b1_ref[...]
    h1 = jnp.maximum(h1, 0.0).astype(jnp.bfloat16)
    h2 = jnp.dot(h1, w2_ref[...], preferred_element_type=jnp.float32) + b2_ref[...]
    h2 = jnp.maximum(h2, 0.0).astype(jnp.bfloat16)
    z = jnp.dot(h2, w3_ref[...], preferred_element_type=jnp.float32) + b3_ref[...]  # (B_pad, A_pad) f32

    # Softmax over dim=0 (the batch axis, exactly nn.Softmax(dim=0)).  Padded batch
    # rows are masked to a huge negative BEFORE the max, so exp(...) == 0 for them.
    if valid_rows < padded_rows:                       # static at trace time
        row = jax.lax.broadcasted_iota(jnp.int32, z.shape, 0)
        z = jnp.where(row < valid_rows, z, NEG_INF)
    m = jnp.max(z, axis=0, keepdims=True)
    e = jnp.exp(z - m)
    s = jnp.sum(e, axis=0, keepdims=True)
    # Exact division: pl.reciprocal(approx=True) (~1e-3 rel. error) previously broke the
    # "columns sum to 1" property; the exact divide is negligible at this size.
    o_ref[...] = e / s


def deep_cem_forward(x, params):
    """softmax(dim=0)(MLP(x)) matching the PyTorch DeepCEM forward.  x: [B, state_dim] f32."""
    w1, b1, w2, b2, w3, b3 = params
    B, S = x.shape
    H = w1.shape[1]
    A = w3.shape[1]

    H_pad = _round_up(H, LANE)
    A_pad = _round_up(A, LANE)
    B_pad = _round_up(B, SUBLANE)       # batch padded to sublanes only; feature dim left at S

    f32, bf16 = jnp.float32, jnp.bfloat16

    def pad2(a, r, c, dtype):
        a = a.astype(dtype)
        if a.shape == (r, c):
            return a
        return jnp.zeros((r, c), dtype).at[: a.shape[0], : a.shape[1]].set(a)

    # x: only the batch dim is padded (multiple of 8).  Not padding S keeps the largest
    # HBM stream at its real size (no 8x inflation, no extra pad copy).
    x_p = pad2(x, B_pad, S, bf16)
    # Weights/biases: lane-pad output dims to 128 (lane-dense MXU / stores); zero padding
    # is exact because padded hidden units stay identically 0 through ReLU.
    w1_p = pad2(w1, S, H_pad, bf16)
    w2_p = pad2(w2, H_pad, H_pad, bf16)
    w3_p = pad2(w3, H_pad, A_pad, bf16)
    b1_p = pad2(b1.reshape(1, -1), 1, H_pad, f32)
    b2_p = pad2(b2.reshape(1, -1), 1, H_pad, f32)
    b3_p = pad2(b3.reshape(1, -1), 1, A_pad, f32)

    # Cost estimate from the REAL dims (padded dims would overstate work ~4-8x).
    flops = 2 * B * (S * H + H * H + H * A) + 6 * B * A
    bytes_accessed = (B * S * 2 + (S * H + H * H + H * A) * 2 + (2 * H + A) * 4 + B * A * 4)
    cost = pl.CostEstimate(flops=flops, transcendentals=B * A, bytes_accessed=bytes_accessed)

    # Rough resident-VMEM footprint (operands + f32 intermediates), to decide whether to
    # raise the scoped-VMEM limit above the smallest (v5e 16 MiB) default.
    vmem_est = (x_p.size * 2 + (w1_p.size + w2_p.size + w3_p.size) * 2
                + (b1_p.size + b2_p.size + b3_p.size) * 4
                + B_pad * H_pad * 4 * 2 + B_pad * A_pad * 4 * 3)
    vmem_limit = None
    if vmem_est > 16 * 1024 * 1024:
        vmem_limit = min(int(vmem_est * 5 // 4), 64 * 1024 * 1024)
    # TODO(synk): for very large batches (footprint approaching v7x's 64 MiB physical VMEM),
    # replace this fully-resident fused kernel with a two-pass dim=0 softmax over batch tiles
    # (and split the batch across the two v7x TensorCores with a cross-TC combine).

    vmem = pltpu.MemorySpace.VMEM
    probs = pl.pallas_call(
        functools.partial(deep_cem_kernel, valid_rows=B, padded_rows=B_pad),
        out_shape=jax.ShapeDtypeStruct((B_pad, A_pad), f32),
        in_specs=[pl.BlockSpec(memory_space=vmem)] * 7,
        out_specs=pl.BlockSpec(memory_space=vmem),
        compiler_params=pltpu.CompilerParams(vmem_limit_bytes=vmem_limit),
        cost_estimate=cost,
    )(x_p, w1_p, b1_p, w2_p, b2_p, w3_p, b3_p)

    return probs[:B, :A]


def init_params(key, state_dim, action_n):
    # Deterministic synthetic init (Kaiming-uniform-like scale, as PyTorch nn.Linear).
    ks = jax.random.split(key, 6)

    def lin(kw, kb, fan_in, fan_out):
        bound = 1.0 / math.sqrt(fan_in)
        w = jax.random.uniform(kw, (fan_in, fan_out), jnp.float32, -bound, bound)
        b = jax.random.uniform(kb, (1, fan_out), jnp.float32, -bound, bound)
        return w, b

    w1, b1 = lin(ks[0], ks[1], state_dim, HIDDEN)
    w2, b2 = lin(ks[2], ks[3], HIDDEN, HIDDEN)
    w3, b3 = lin(ks[4], ks[5], HIDDEN, action_n)
    return (w1, b1, w2, b2, w3, b3)


def reference_forward_f32(x, params):
    # Exact module semantics (f32 everywhere), softmax over dim=0 as in nn.Softmax(dim=0).
    w1, b1, w2, b2, w3, b3 = params
    h1 = jnp.maximum(x @ w1 + b1, 0.0)
    h2 = jnp.maximum(h1 @ w2 + b2, 0.0)
    return jax.nn.softmax(h2 @ w3 + b3, axis=0)


def reference_forward_bf16(x, params):
    # Mimics the kernel's numerics: bf16 matmul operands, f32 accumulation / bias / ReLU.
    w1, b1, w2, b2, w3, b3 = params
    bf = jnp.bfloat16
    h1 = jnp.maximum(
        jnp.dot(x.astype(bf), w1.astype(bf), preferred_element_type=jnp.float32) + b1, 0.0)
    h2 = jnp.maximum(
        jnp.dot(h1.astype(bf), w2.astype(bf), preferred_element_type=jnp.float32) + b2, 0.0)
    logits = jnp.dot(h2.astype(bf), w3.astype(bf), preferred_element_type=jnp.float32) + b3
    return jax.nn.softmax(logits, axis=0)


if __name__ == "__main__":
    key = jax.random.PRNGKey(0)
    k_x, k_p = jax.random.split(key)

    # Small shapes consistent with the module; batch=203 exercises batch padding (208)
    # and the padded-row mask inside the dim=0 softmax.
    batch, state_dim, action_n = 203, 16, 4
    x = jax.random.normal(k_x, (batch, state_dim), jnp.float32)
    params = init_params(k_p, state_dim, action_n)

    fwd = jax.jit(deep_cem_forward)
    out = jax.block_until_ready(fwd(x, params))
    assert out.shape == (batch, action_n)

    ref_q = reference_forward_bf16(x, params)   # same bf16-matmul quantization as the kernel
    ref_f = reference_forward_f32(x, params)    # exact f32 module semantics
    assert jnp.allclose(out, ref_q, atol=1e-3, rtol=2e-2), "mismatch vs bf16 reference"
    assert jnp.allclose(out, ref_f, atol=2e-3, rtol=5e-2), "mismatch vs f32 reference"
    assert jnp.allclose(out.sum(axis=0), 1.0, atol=1e-3), "softmax(dim=0) columns must sum to 1"

    print("KERNEL_OK")
</pallas_src>

<mosaic_0001>
module attributes {stable_mosaic.version = 11 : i64} {
  func.func @deep_cem_kernel(%arg0: memref<208x16xbf16, #tpu.memory_space<vmem>>, %arg1: memref<16x128xbf16, #tpu.memory_space<vmem>>, %arg2: memref<1x128xf32, #tpu.memory_space<vmem>>, %arg3: memref<128x128xbf16, #tpu.memory_space<vmem>>, %arg4: memref<1x128xf32, #tpu.memory_space<vmem>>, %arg5: memref<128x128xbf16, #tpu.memory_space<vmem>>, %arg6: memref<1x128xf32, #tpu.memory_space<vmem>>, %arg7: memref<208x128xf32, #tpu.memory_space<vmem>>) attributes {dimension_semantics = [], scalar_prefetch = 0 : i64, scratch_operands = 0 : i64, tpu.core_type = #tpu.core_type<tc>} {
    %c0 = arith.constant 0 : index
    %c0_0 = arith.constant 0 : index
    %0 = vector.load %arg0[%c0, %c0_0] : memref<208x16xbf16, #tpu.memory_space<vmem>>, vector<208x16xbf16>
    %c0_1 = arith.constant 0 : index
    %c0_2 = arith.constant 0 : index
    %1 = vector.load %arg1[%c0_1, %c0_2] : memref<16x128xbf16, #tpu.memory_space<vmem>>, vector<16x128xbf16>
    %cst = arith.constant dense<0.000000e+00> : vector<208x128xf32>
    %2 = tpu.matmul %0, %1, %cst {dimension_numbers = #tpu.dot_dimension_numbers<[1], [0], [0], [1], [0, 0, 1, 1], [], []>} : vector<208x16xbf16>, vector<16x128xbf16>, vector<208x128xf32> -> vector<208x128xf32>
    %c0_3 = arith.constant 0 : index
    %c0_4 = arith.constant 0 : index
    %3 = vector.load %arg2[%c0_3, %c0_4] : memref<1x128xf32, #tpu.memory_space<vmem>>, vector<1x128xf32>
    %4 = vector.broadcast %3 : vector<1x128xf32> to vector<208x128xf32>
    %5 = arith.addf %2, %4 : vector<208x128xf32>
    %cst_5 = arith.constant 0.000000e+00 : f32
    %6 = vector.broadcast %cst_5 : f32 to vector<208x128xf32>
    %7 = arith.maximumf %5, %6 : vector<208x128xf32>
    %8 = arith.truncf %7 : vector<208x128xf32> to vector<208x128xbf16>
    %c0_6 = arith.constant 0 : index
    %c0_7 = arith.constant 0 : index
    %9 = vector.load %arg3[%c0_6, %c0_7] : memref<128x128xbf16, #tpu.memory_space<vmem>>, vector<128x128xbf16>
    %cst_8 = arith.constant dense<0.000000e+00> : vector<208x128xf32>
    %10 = tpu.matmul %8, %9, %cst_8 {dimension_numbers = #tpu.dot_dimension_numbers<[1], [0], [0], [1], [0, 0, 1, 1], [], []>} : vector<208x128xbf16>, vector<128x128xbf16>, vector<208x128xf32> -> vector<208x128xf32>
    %c0_9 = arith.constant 0 : index
    %c0_10 = arith.constant 0 : index
    %11 = vector.load %arg4[%c0_9, %c0_10] : memref<1x128xf32, #tpu.memory_space<vmem>>, vector<1x128xf32>
    %12 = vector.broadcast %11 : vector<1x128xf32> to vector<208x128xf32>
    %13 = arith.addf %10, %12 : vector<208x128xf32>
    %cst_11 = arith.constant 0.000000e+00 : f32
    %14 = vector.broadcast %cst_11 : f32 to vector<208x128xf32>
    %15 = arith.maximumf %13, %14 : vector<208x128xf32>
    %16 = arith.truncf %15 : vector<208x128xf32> to vector<208x128xbf16>
    %c0_12 = arith.constant 0 : index
    %c0_13 = arith.constant 0 : index
    %17 = vector.load %arg5[%c0_12, %c0_13] : memref<128x128xbf16, #tpu.memory_space<vmem>>, vector<128x128xbf16>
    %cst_14 = arith.constant dense<0.000000e+00> : vector<208x128xf32>
    %18 = tpu.matmul %16, %17, %cst_14 {dimension_numbers = #tpu.dot_dimension_numbers<[1], [0], [0], [1], [0, 0, 1, 1], [], []>} : vector<208x128xbf16>, vector<128x128xbf16>, vector<208x128xf32> -> vector<208x128xf32>
    %c0_15 = arith.constant 0 : index
    %c0_16 = arith.constant 0 : index
    %19 = vector.load %arg6[%c0_15, %c0_16] : memref<1x128xf32, #tpu.memory_space<vmem>>, vector<1x128xf32>
    %20 = vector.broadcast %19 : vector<1x128xf32> to vector<208x128xf32>
    %21 = arith.addf %18, %20 : vector<208x128xf32>
    %22 = tpu.iota {dimensions = array<i32: 0>} : vector<208x128xi32>
    %c203_i32 = arith.constant 203 : i32
    %23 = vector.broadcast %c203_i32 : i32 to vector<208x128xi32>
    %24 = arith.cmpi slt, %22, %23 : vector<208x128xi32>
    %cst_17 = arith.constant -1.000000e+30 : f32
    %25 = vector.broadcast %cst_17 : f32 to vector<208x128xf32>
    %26 = arith.select %24, %21, %25 : vector<208x128xi1>, vector<208x128xf32>
    %cst_18 = arith.constant dense<0xFF800000> : vector<128xf32>
    %27 = vector.multi_reduction <maximumf>, %26, %cst_18 [0] : vector<208x128xf32> to vector<128xf32>
    %28 = vector.shape_cast %27 : vector<128xf32> to vector<1x128xf32>
    %29 = vector.broadcast %28 : vector<1x128xf32> to vector<208x128xf32>
    %30 = arith.subf %26, %29 : vector<208x128xf32>
    %31 = math.exp %30 : vector<208x128xf32>
    %cst_19 = arith.constant dense<0.000000e+00> : vector<128xf32>
    %32 = vector.multi_reduction <add>, %31, %cst_19 [0] : vector<208x128xf32> to vector<128xf32>
    %33 = vector.shape_cast %32 : vector<128xf32> to vector<1x128xf32>
    %34 = vector.broadcast %33 : vector<1x128xf32> to vector<208x128xf32>
    %35 = arith.divf %31, %34 : vector<208x128xf32>
    %c0_20 = arith.constant 0 : index
    %c0_21 = arith.constant 0 : index
    %36 = vector.load %arg7[%c0_20, %c0_21] : memref<208x128xf32, #tpu.memory_space<vmem>>, vector<208x128xf32>
    tpu.vector_store %arg7[%c0_20, %c0_21], %35 {strides = array<i32>} : memref<208x128xf32, #tpu.memory_space<vmem>>, vector<208x128xf32>,
    return
  }
}

</mosaic_0001>

<bundles_post_ra>
// kernel: deep_cem_forward.1
= control target key start
LH: loop header
LB: loop body
LE: loop exit
PB: predicated region body
PF: predicated region fallthrough
CT: control target
= control target key end

     0   :  { %vm130_vm0 = vcmask 130048   ;;  %s1660_s1 = inlined_call_operand.vmem [shape: bf16[16,128], index: 1, kind: input, shape index: {}]   ;;  %s1661_s0 = inlined_call_operand.vmem [shape: bf16[208,16], index: 0, kind: input, shape index: {}]   ;;  %s1662_s2 = inlined_call_operand.vmem [shape: f32[1,128], index: 2, kind: input, shape index: {}]   ;;  %s1663_s3 = inlined_call_operand.vmem [shape: bf16[128,128], index: 3, kind: input, shape index: {}]   ;;  %s1664_s4 = inlined_call_operand.vmem [shape: f32[1,128], index: 4, kind: input, shape index: {}]   ;;  %s1665_s5 = inlined_call_operand.vmem [shape: bf16[128,128], index: 5, kind: input, shape index: {}]   ;;  %s1666_s6 = inlined_call_operand.vmem [shape: f32[1,128], index: 6, kind: input, shape index: {}]   ;;  %s1667_s7 = inlined_call_operand.vmem [shape: f32[208,128], index: 7, kind: output, shape index: {}]  }
   0x1   :  { %v1041_v0 = vld [vmem:[%s1660_s1] sm:$0xff]  ;;  %v1029_v2 = vld [vmem:[%s1661_s0 + $0x8] sm:$0xff]  ;;  %v1030_v3 = vld [vmem:[%s1661_s0 + $0x10] sm:$0xff] }
   0x2   :  { %v1028_v1 = vld [vmem:[%s1661_s0] sm:$0xff]  ;;  %177 = vmatpush.bf16.msra.mxu0 %v1041_v0  ;;  %1058 = vmatpush.bf16.msra.mxu3 %v1041_v0  ;;  %v1031_v4 = vld [vmem:[%s1661_s0 + $0x18] sm:$0xff]  ;;  %v1033_v7 = vld [vmem:[%s1661_s0 + $0x28] sm:$0xff] }
   0x3   :  { %v1032_v5 = vld [vmem:[%s1661_s0 + $0x20] sm:$0xff]  ;;  %v1049_v6 = vld [vmem:[%s1663_s3 + $0x38] sm:$0xff]  ;;  %v1048_v8 = vld [vmem:[%s1663_s3 + $0x30] sm:$0xff] }
   0x4   :  { %351 = vmatpush.bf16.msra.mxu1 %v1049_v6  ;;  %v1047_v9 = vld [vmem:[%s1663_s3 + $0x28] sm:$0xff]  ;;  %v1046_v10 = vld [vmem:[%s1663_s3 + $0x20] sm:$0xff]  ;;  %v1045_v11 = vld [vmem:[%s1663_s3 + $0x18] sm:$0xff] }
   0x5   :  { %951 = vmatmul.msk.bf16.vlgmr.msra.gmra.mxu0 %vm130_vm0, %v1028_v1  ;;  %v1034_v12 = vld [vmem:[%s1661_s0 + $0x30] sm:$0xff]  ;;  %v1043_v14 = vld [vmem:[%s1663_s3 + $0x8] sm:$0xff]  ;;  %v1042_v15 = vld [vmem:[%s1663_s3] sm:$0xff] }
   0x6   :  { %1059 = vmatpush.bf16.msrb.mxu3 %v1049_v6  ;;  %v1044_v13 = vld [vmem:[%s1663_s3 + $0x10] sm:$0xff]  ;;  %v1035_v16 = vld [vmem:[%s1661_s0 + $0x38] sm:$0xff]  ;;  %v1036_v17 = vld [vmem:[%s1661_s0 + $0x40] sm:$0xff] }
   0x7   :  { %v1237_v19 = vld [vmem:[%s1662_s2] ss:$0 sm:$0xff]  ;;  %v1039_v20 = vld [vmem:[%s1661_s0 + $0x58] sm:$0xff]  ;;  %v1037_v27 = vld [vmem:[%s1661_s0 + $0x48] sm:$0xff] }
   0x8   :  { %352 = vmatpush.bf16.msra.mxu1 %v1048_v8  ;;  %962 = vmatmul.msk.bf16.vlgmr.msra.gmra.mxu3 %vm130_vm0, %v1039_v20  ;;  %v1040_v29 = vld [vmem:[%s1661_s0 + $0x60] sm:$0xff]  ;;  %v1038_v36 = vld [vmem:[%s1661_s0 + $0x50] sm:$0xff]  ;;  %v1057_v62 = vld [vmem:[%s1665_s5 + $0x38] sm:$0xff] }
   0x9   :  { %532 = vmatpush.bf16.msra.mxu2 %v1057_v62 }
   0xa   :  { %1060 = vmatpush.bf16.msrb.mxu3 %v1048_v8 }
   0xc   :  { %353 = vmatpush.bf16.msra.mxu1 %v1047_v9 }
   0xe   :  { %1061 = vmatpush.bf16.msrb.mxu3 %v1047_v9  ;;  %v1053_v9 = vld [vmem:[%s1665_s5 + $0x18] sm:$0xff] }
  0x10   :  { %354 = vmatpush.bf16.msra.mxu1 %v1046_v10 }
  0x12   :  { %1062 = vmatpush.bf16.msrb.mxu3 %v1046_v10 }
  0x14   :  { %355 = vmatpush.bf16.msra.mxu1 %v1045_v11 }
  0x15   :  { %952 = vmatmul.msk.bf16.gmra.mxu0 %vm130_vm0, %v1029_v2  ;;  %v1056_v2 = vld [vmem:[%s1665_s5 + $0x30] sm:$0xff] }
  0x16   :  { %1063 = vmatpush.bf16.msrb.mxu3 %v1045_v11  ;;  %533 = vmatpush.bf16.msra.mxu2 %v1056_v2 }
  0x18   :  { %356 = vmatpush.bf16.msra.mxu1 %v1044_v13  ;;  %963 = vmatmul.msk.bf16.gmra.mxu3 %vm130_vm0, %v1040_v29 }
  0x1a   :  { %1064 = vmatpush.bf16.msrb.mxu3 %v1044_v13  ;;  %v1052_v13 = vld [vmem:[%s1665_s5 + $0x10] sm:$0xff] }
  0x1c   :  { %357 = vmatpush.bf16.msra.mxu1 %v1043_v14 }
  0x1e   :  { %1065 = vmatpush.bf16.msrb.mxu3 %v1043_v14 }
  0x20   :  { %358 = vmatpush.bf16.msra.mxu1 %v1042_v15 }
  0x22   :  { %1066 = vmatpush.bf16.msrb.mxu3 %v1042_v15  ;;  %v1051_v15 = vld [vmem:[%s1665_s5 + $0x8] sm:$0xff] }
  0x25   :  { %953 = vmatmul.msk.bf16.gmra.mxu0 %vm130_vm0, %v1030_v3 }
  0x26   :  { %1067 = vmatpush.bf16.msra.mxu3 %v1057_v62 }
  0x2a   :  { %1068 = vmatpush.bf16.msra.mxu3 %v1056_v2 }
  0x35   :  { %954 = vmatmul.msk.bf16.gmra.mxu0 %vm130_vm0, %v1031_v4  ;;  %v1055_v4 = vld [vmem:[%s1665_s5 + $0x28] sm:$0xff] }
  0x36   :  { %534 = vmatpush.bf16.msra.mxu2 %v1055_v4  ;;  %1069 = vmatpush.bf16.msra.mxu3 %v1055_v4 }
  0x45   :  { %955 = vmatmul.msk.bf16.gmra.mxu0 %vm130_vm0, %v1032_v5  ;;  %v1054_v5 = vld [vmem:[%s1665_s5 + $0x20] sm:$0xff] }
  0x46   :  { %535 = vmatpush.bf16.msra.mxu2 %v1054_v5  ;;  %1070 = vmatpush.bf16.msra.mxu3 %v1054_v5 }
  0x4a   :  { %536 = vmatpush.bf16.msra.mxu2 %v1053_v9  ;;  %1071 = vmatpush.bf16.msra.mxu3 %v1053_v9 }
  0x4e   :  { %537 = vmatpush.bf16.msra.mxu2 %v1052_v13  ;;  %1072 = vmatpush.bf16.msra.mxu3 %v1052_v13 }
  0x52   :  { %538 = vmatpush.bf16.msra.mxu2 %v1051_v15  ;;  %1073 = vmatpush.bf16.msra.mxu3 %v1051_v15 }
  0x55   :  { %956 = vmatmul.msk.bf16.gmra.mxu0 %vm130_vm0, %v1033_v7 }
  0x65   :  { %957 = vmatmul.msk.bf16.gmra.mxu0 %vm130_vm0, %v1034_v12 }
  0x75   :  { %958 = vmatmul.msk.bf16.gmra.mxu0 %vm130_vm0, %v1035_v16  ;;  %v1050_v16 = vld [vmem:[%s1665_s5] sm:$0xff] }
  0x76   :  { %539 = vmatpush.bf16.msra.mxu2 %v1050_v16  ;;  %1074 = vmatpush.bf16.msra.mxu3 %v1050_v16 }
  0x82   :  { %v179_v18 = vpop.f32.mrf.mxu0 }
  0x83   :  { %v180_v21 = vadd.f32 %v1237_v19, %v179_v18 }
  0x85   :  { %959 = vmatmul.msk.bf16.gmra.mxu0 %vm130_vm0, %v1036_v17  ;;  %v244_v24 = vmax.f32 %v180_v21, 0.0 }
  0x8a   :  { %v181_v22 = vpop.f32.mrf.mxu0 }
  0x8b   :  { %v182_v23 = vadd.f32 %v1237_v19, %v181_v22 }
  0x8d   :  { %v245_v25 = vmax.f32 %v182_v23, 0.0 }
  0x8f   :  { %v270_v26 = vpack.c.bf16 %v245_v25, %v244_v24 }
  0x91   :  { %359 = vmatmul.bf16.vlgmr.msra.gmra.mxu1 %v270_v26 }
  0x92   :  { %v184_v28 = vpop.f32.mrf.mxu0 }
  0x93   :  { %v185_v30 = vadd.f32 %v1237_v19, %v184_v28 }
  0x95   :  { %960 = vmatmul.msk.bf16.gmra.mxu0 %vm130_vm0, %v1037_v27  ;;  %v246_v33 = vmax.f32 %v185_v30, 0.0 }
  0x9a   :  { %v186_v31 = vpop.f32.mrf.mxu0 }
  0x9b   :  { %v187_v32 = vadd.f32 %v1237_v19, %v186_v31 }
  0x9d   :  { %v247_v34 = vmax.f32 %v187_v32, 0.0  ;;  %v1301_v32 = vld [vmem:[%s1664_s4] ss:$0 sm:$0xff] }
  0x9f   :  { %v271_v35 = vpack.c.bf16 %v247_v34, %v246_v33 }
  0xa1   :  { %364 = vmatmul.bf16.gmra.mxu1 %v271_v35 }
  0xa2   :  { %v189_v37 = vpop.f32.mrf.mxu0 }
  0xa3   :  { %v190_v38 = vadd.f32 %v1237_v19, %v189_v37 }
  0xa5   :  { %961 = vmatmul.msk.bf16.gmra.mxu0 %vm130_vm0, %v1038_v36  ;;  %v248_v41 = vmax.f32 %v190_v38, 0.0 }
  0xaa   :  { %v191_v39 = vpop.f32.mrf.mxu0 }
  0xab   :  { %v192_v40 = vadd.f32 %v1237_v19, %v191_v39 }
  0xad   :  { %v249_v42 = vmax.f32 %v192_v40, 0.0 }
  0xaf   :  { %v272_v43 = vpack.c.bf16 %v249_v42, %v248_v41 }
  0xb1   :  { %369 = vmatmul.bf16.gmra.mxu1 %v272_v43 }
  0xb2   :  { %v194_v44 = vpop.f32.mrf.mxu0 }
  0xb3   :  { %v195_v45 = vadd.f32 %v1237_v19, %v194_v44 }
  0xb5   :  { %v250_v48 = vmax.f32 %v195_v45, 0.0 }
  0xba   :  { %v196_v46 = vpop.f32.mrf.mxu0 }
  0xbb   :  { %v197_v47 = vadd.f32 %v1237_v19, %v196_v46 }
  0xbd   :  { %v251_v49 = vmax.f32 %v197_v47, 0.0 }
  0xbf   :  { %v273_v50 = vpack.c.bf16 %v251_v49, %v250_v48 }
  0xc1   :  { %374 = vmatmul.bf16.gmra.mxu1 %v273_v50  ;;  %v234_v50 = vpop.f32.mrf.mxu3 }
  0xc2   :  { %v199_v51 = vpop.f32.mrf.mxu0 }
  0xc3   :  { %v200_v52 = vadd.f32 %v1237_v19, %v199_v51 }
  0xc5   :  { %v252_v55 = vmax.f32 %v200_v52, 0.0 }
  0xc9   :  { %v236_v62 = vpop.f32.mrf.mxu3 }
  0xca   :  { %v201_v53 = vpop.f32.mrf.mxu0  ;;  %v237_v2 = vadd.f32 %v1237_v19, %v236_v62 }
  0xcb   :  { %v202_v54 = vadd.f32 %v1237_v19, %v201_v53 }
  0xcd   :  { %v253_v56 = vmax.f32 %v202_v54, 0.0 }
  0xcf   :  { %v274_v57 = vpack.c.bf16 %v253_v56, %v252_v55 }
  0xd1   :  { %379 = vmatmul.bf16.gmra.mxu1 %v274_v57 }
  0xd2   :  { %v204_v58 = vpop.f32.mrf.mxu0 }
  0xd3   :  { %v205_v59 = vadd.f32 %v1237_v19, %v204_v58 }
  0xd5   :  { %v254_v63 = vmax.f32 %v205_v59, 0.0 }
  0xda   :  { %v206_v60 = vpop.f32.mrf.mxu0 }
  0xdb   :  { %v207_v61 = vadd.f32 %v1237_v19, %v206_v60 }
  0xdd   :  { %v255_v0 = vmax.f32 %v207_v61, 0.0 }
  0xdf   :  { %v275_v1 = vpack.c.bf16 %v255_v0, %v254_v63 }
  0xe1   :  { %384 = vmatmul.bf16.gmra.mxu1 %v275_v1  ;;  %v235_v1 = vadd.f32 %v1237_v19, %v234_v50 }
  0xe2   :  { %v209_v3 = vpop.f32.mrf.mxu0 }
  0xe3   :  { %v210_v6 = vadd.f32 %v1237_v19, %v209_v3 }
  0xe5   :  { %v256_v10 = vmax.f32 %v210_v6, 0.0  ;;  %v239_v6 = vpop.f32.mrf.mxu3 }
  0xe6   :  { %v240_v15 = vadd.f32 %v1237_v19, %v239_v6 }
  0xea   :  { %v211_v7 = vpop.f32.mrf.mxu0 }
  0xeb   :  { %v212_v8 = vadd.f32 %v1237_v19, %v211_v7  ;;  %v266_v7 = vmax.f32 %v235_v1, 0.0 }
  0xed   :  { %v257_v11 = vmax.f32 %v212_v8, 0.0  ;;  %v267_v8 = vmax.f32 %v237_v2, 0.0 }
  0xef   :  { %v276_v12 = vpack.c.bf16 %v257_v11, %v256_v10  ;;  %v281_v11 = vpack.c.bf16 %v267_v8, %v266_v7 }
  0xf1   :  { %389 = vmatmul.bf16.gmra.mxu1 %v276_v12  ;;  %v241_v12 = vpop.f32.mrf.mxu3 }
  0xf2   :  { %v214_v14 = vpop.f32.mrf.mxu0  ;;  %v242_v16 = vadd.f32 %v1237_v19, %v241_v12 }
  0xf3   :  { %v215_v17 = vadd.f32 %v1237_v19, %v214_v14 }
  0xf5   :  { %v258_v21 = vmax.f32 %v215_v17, 0.0 }
  0xfa   :  { %v216_v18 = vpop.f32.mrf.mxu0 }
  0xfb   :  { %v217_v20 = vadd.f32 %v1237_v19, %v216_v18 }
  0xfd   :  { %v259_v22 = vmax.f32 %v217_v20, 0.0 }
  0xff   :  { %v277_v23 = vpack.c.bf16 %v259_v22, %v258_v21  ;;  %v268_v21 = vmax.f32 %v240_v15, 0.0  ;;  %v269_v22 = vmax.f32 %v242_v16, 0.0 }
 0x101   :  { %394 = vmatmul.bf16.gmra.mxu1 %v277_v23 }
 0x102   :  { %v219_v24 = vpop.f32.mrf.mxu0 }
 0x103   :  { %v220_v25 = vadd.f32 %v1237_v19, %v219_v24 }
 0x105   :  { %v260_v28 = vmax.f32 %v220_v25, 0.0  ;;  %v282_v25 = vpack.c.bf16 %v269_v22, %v268_v21 }
 0x10a   :  { %v221_v26 = vpop.f32.mrf.mxu0 }
 0x10b   :  { %v222_v27 = vadd.f32 %v1237_v19, %v221_v26 }
 0x10d   :  { %v261_v29 = vmax.f32 %v222_v27, 0.0 }
 0x10e   :  { %v360_v30 = vpop.f32.mrf.mxu1 }
 0x10f   :  { %v278_v31 = vpack.c.bf16 %v261_v29, %v260_v28  ;;  %v361_v34 = vadd.f32 %v1301_v32, %v360_v30 }
 0x111   :  { %399 = vmatmul.bf16.gmra.mxu1 %v278_v31  ;;  %v425_v37 = vmax.f32 %v361_v34, 0.0 }
 0x112   :  { %v224_v33 = vpop.f32.mrf.mxu0 }
 0x113   :  { %v225_v38 = vadd.f32 %v1237_v19, %v224_v33 }
 0x115   :  { %v262_v43 = vmax.f32 %v225_v38, 0.0 }
 0x116   :  { %v362_v35 = vpop.f32.mrf.mxu1 }
 0x117   :  { %v363_v36 = vadd.f32 %v1301_v32, %v362_v35 }
 0x119   :  { %v426_v39 = vmax.f32 %v363_v36, 0.0 }
 0x11a   :  { %v226_v40 = vpop.f32.mrf.mxu0 }
 0x11b   :  { %v227_v41 = vadd.f32 %v1237_v19, %v226_v40  ;;  %v451_v42 = vpack.c.bf16 %v426_v39, %v425_v37 }
 0x11d   :  { %v263_v44 = vmax.f32 %v227_v41, 0.0  ;;  %540 = vmatmul.bf16.vlgmr.msra.gmra.mxu2 %v451_v42 }
 0x11e   :  { %v365_v45 = vpop.f32.mrf.mxu1 }
 0x11f   :  { %v279_v46 = vpack.c.bf16 %v263_v44, %v262_v43  ;;  %v366_v48 = vadd.f32 %v1301_v32, %v365_v45 }
 0x121   :  { %404 = vmatmul.bf16.gmra.mxu1 %v279_v46  ;;  %v427_v52 = vmax.f32 %v366_v48, 0.0 }
 0x122   :  { %v229_v47 = vpop.f32.mrf.mxu0 }
 0x123   :  { %v230_v53 = vadd.f32 %v1237_v19, %v229_v47 }
 0x125   :  { %v264_v58 = vmax.f32 %v230_v53, 0.0 }
 0x126   :  { %v367_v49 = vpop.f32.mrf.mxu1 }
 0x127   :  { %v368_v51 = vadd.f32 %v1301_v32, %v367_v49 }
 0x129   :  { %v428_v54 = vmax.f32 %v368_v51, 0.0 }
 0x12a   :  { %v231_v55 = vpop.f32.mrf.mxu0 }
 0x12b   :  { %v232_v56 = vadd.f32 %v1237_v19, %v231_v55  ;;  %v452_v57 = vpack.c.bf16 %v428_v54, %v427_v52 }
 0x12d   :  { %v265_v59 = vmax.f32 %v232_v56, 0.0  ;;  %545 = vmatmul.bf16.gmra.mxu2 %v452_v57 }
 0x12e   :  { %v370_v60 = vpop.f32.mrf.mxu1 }
 0x12f   :  { %v280_v61 = vpack.c.bf16 %v265_v59, %v264_v58  ;;  %v371_v63 = vadd.f32 %v1301_v32, %v370_v60 }
 0x131   :  { %409 = vmatmul.bf16.vlgmr.msrb.gmra.mxu3 %v280_v61  ;;  %v429_v4 = vmax.f32 %v371_v63, 0.0 }
 0x136   :  { %v372_v0 = vpop.f32.mrf.mxu1 }
 0x137   :  { %v373_v3 = vadd.f32 %v1301_v32, %v372_v0 }
 0x139   :  { %v430_v5 = vmax.f32 %v373_v3, 0.0 }
 0x13b   :  { %v453_v9 = vpack.c.bf16 %v430_v5, %v429_v4 }
 0x13d   :  { %550 = vmatmul.bf16.gmra.mxu2 %v453_v9 }
 0x13e   :  { %v375_v10 = vpop.f32.mrf.mxu1 }
 0x13f   :  { %v376_v13 = vadd.f32 %v1301_v32, %v375_v10  ;;  %v1335_v10 = vld [vmem:[%s1666_s6] ss:$0 sm:$0xff] }
 0x141   :  { %414 = vmatmul.bf16.gmra.mxu3 %v281_v11  ;;  %v431_v18 = vmax.f32 %v376_v13, 0.0 }
 0x146   :  { %v377_v14 = vpop.f32.mrf.mxu1 }
 0x147   :  { %v378_v17 = vadd.f32 %v1301_v32, %v377_v14 }
 0x149   :  { %v432_v20 = vmax.f32 %v378_v17, 0.0 }
 0x14b   :  { %v454_v23 = vpack.c.bf16 %v432_v20, %v431_v18 }
 0x14d   :  { %555 = vmatmul.bf16.gmra.mxu2 %v454_v23 }
 0x14e   :  { %v380_v24 = vpop.f32.mrf.mxu1 }
 0x14f   :  { %v381_v26 = vadd.f32 %v1301_v32, %v380_v24 }
 0x151   :  { %419 = vmatmul.bf16.gmra.mxu3 %v282_v25  ;;  %v433_v29 = vmax.f32 %v381_v26, 0.0 }
 0x156   :  { %v382_v27 = vpop.f32.mrf.mxu1 }
 0x157   :  { %v383_v28 = vadd.f32 %v1301_v32, %v382_v27 }
 0x159   :  { %v434_v30 = vmax.f32 %v383_v28, 0.0 }
 0x15b   :  { %v455_v31 = vpack.c.bf16 %v434_v30, %v433_v29 }
 0x15d   :  { %560 = vmatmul.bf16.gmra.mxu2 %v455_v31 }
 0x15e   :  { %v385_v19 = vpop.f32.mrf.mxu1 }
 0x15f   :  { %v386_v33 = vadd.f32 %v1301_v32, %v385_v19 }
 0x161   :  { %v435_v36 = vmax.f32 %v386_v33, 0.0 }
 0x166   :  { %v387_v34 = vpop.f32.mrf.mxu1 }
 0x167   :  { %v388_v35 = vadd.f32 %v1301_v32, %v387_v34 }
 0x169   :  { %v436_v37 = vmax.f32 %v388_v35, 0.0 }
 0x16b   :  { %v456_v38 = vpack.c.bf16 %v436_v37, %v435_v36 }
 0x16d   :  { %565 = vmatmul.bf16.gmra.mxu2 %v456_v38 }
 0x16e   :  { %v390_v39 = vpop.f32.mrf.mxu1 }
 0x16f   :  { %v391_v40 = vadd.f32 %v1301_v32, %v390_v39 }
 0x171   :  { %v437_v43 = vmax.f32 %v391_v40, 0.0 }
 0x176   :  { %v392_v41 = vpop.f32.mrf.mxu1 }
 0x177   :  { %v393_v42 = vadd.f32 %v1301_v32, %v392_v41 }
 0x179   :  { %v438_v44 = vmax.f32 %v393_v42, 0.0 }
 0x17b   :  { %v457_v45 = vpack.c.bf16 %v438_v44, %v437_v43 }
 0x17d   :  { %570 = vmatmul.bf16.gmra.mxu2 %v457_v45 }
 0x17e   :  { %v395_v46 = vpop.f32.mrf.mxu1 }
 0x17f   :  { %v396_v47 = vadd.f32 %v1301_v32, %v395_v46 }
 0x181   :  { %v439_v50 = vmax.f32 %v396_v47, 0.0 }
 0x186   :  { %v397_v48 = vpop.f32.mrf.mxu1 }
 0x187   :  { %v398_v49 = vadd.f32 %v1301_v32, %v397_v48 }
 0x189   :  { %v440_v51 = vmax.f32 %v398_v49, 0.0 }
 0x18b   :  { %v458_v52 = vpack.c.bf16 %v440_v51, %v439_v50 }
 0x18d   :  { %575 = vmatmul.bf16.gmra.mxu2 %v458_v52 }
 0x18e   :  { %v400_v53 = vpop.f32.mrf.mxu1 }
 0x18f   :  { %v401_v54 = vadd.f32 %v1301_v32, %v400_v53 }
 0x191   :  { %v441_v57 = vmax.f32 %v401_v54, 0.0 }
 0x196   :  { %v402_v55 = vpop.f32.mrf.mxu1 }
 0x197   :  { %v403_v56 = vadd.f32 %v1301_v32, %v402_v55 }
 0x199   :  { %v442_v58 = vmax.f32 %v403_v56, 0.0 }
 0x19b   :  { %v459_v59 = vpack.c.bf16 %v442_v58, %v441_v57 }
 0x19d   :  { %580 = vmatmul.bf16.gmra.mxu2 %v459_v59 }
 0x19e   :  { %v405_v60 = vpop.f32.mrf.mxu1 }
 0x19f   :  { %v406_v62 = vadd.f32 %v1301_v32, %v405_v60 }
 0x1a0   :  { %v541_v61 = vpop.f32.mrf.mxu2 }
 0x1a1   :  { %v443_v2 = vmax.f32 %v406_v62, 0.0  ;;  %v1339_v15 = vadd.f32 %v1335_v10, %v541_v61 }
 0x1a6   :  { %v407_v63 = vpop.f32.mrf.mxu1 }
 0x1a7   :  { %v408_v0 = vadd.f32 %v1301_v32, %v407_v63 }
 0x1a8   :  { %v543_v1 = vpop.f32.mrf.mxu2 }
 0x1a9   :  { %v444_v3 = vmax.f32 %v408_v0, 0.0  ;;  %v1347_v22 = vadd.f32 %v1335_v10, %v543_v1 }
 0x1ab   :  { %v460_v4 = vpack.c.bf16 %v444_v3, %v443_v2 }
 0x1ad   :  { %585 = vmatmul.bf16.gmra.mxu2 %v460_v4 }
 0x1b0   :  { %v546_v5 = vpop.f32.mrf.mxu2 }
 0x1b1   :  { %v1357_v31 = vadd.f32 %v1335_v10, %v546_v5 }
 0x1b4   :  { %v410_v6 = vpop.f32.mrf.mxu3 }
 0x1b5   :  { %v411_v8 = vadd.f32 %v1301_v32, %v410_v6 }
 0x1b7   :  { %v445_v12 = vmax.f32 %v411_v8, 0.0 }
 0x1b8   :  { %v548_v7 = vpop.f32.mrf.mxu2 }
 0x1b9   :  { %v1365_v37 = vadd.f32 %v1335_v10, %v548_v7 }
 0x1bc   :  { %v412_v9 = vpop.f32.mrf.mxu3 }
 0x1bd   :  { %v413_v11 = vadd.f32 %v1301_v32, %v412_v9 }
 0x1bf   :  { %v446_v13 = vmax.f32 %v413_v11, 0.0 }
 0x1c0   :  { %v551_v14 = vpop.f32.mrf.mxu2 }
 0x1c1   :  { %v461_v16 = vpack.c.bf16 %v446_v13, %v445_v12  ;;  %v1342_v17 = vadd.f32 %v1335_v10, %v551_v14 }
 0x1c3   :  { %v685_v18 = vmax.f32 %v1339_v15, %v1342_v17  ;;  %590 = vmatmul.bf16.vlgmr.msra.gmra.mxu3 %v461_v16 }
 0x1c4   :  { %v415_v20 = vpop.f32.mrf.mxu3 }
 0x1c5   :  { %v416_v24 = vadd.f32 %v1301_v32, %v415_v20 }
 0x1c7   :  { %v447_v28 = vmax.f32 %v416_v24, 0.0 }
 0x1c8   :  { %v553_v21 = vpop.f32.mrf.mxu2 }
 0x1c9   :  { %v1350_v23 = vadd.f32 %v1335_v10, %v553_v21  ;;  %v606_v21 = vlaneseq }
 0x1cb   :  { %v686_v25 = vmax.f32 %v1347_v22, %v1350_v23 }
 0x1cc   :  { %v417_v26 = vpop.f32.mrf.mxu3 }
 0x1cd   :  { %v418_v27 = vadd.f32 %v1301_v32, %v417_v26  ;;  %v607_v26 = vshrl.u32 %v606_v21, 7 }
 0x1cf   :  { %v448_v29 = vmax.f32 %v418_v27, 0.0 }
 0x1d0   :  { %v556_v30 = vpop.f32.mrf.mxu2 }
 0x1d1   :  { %v1360_v19 = vadd.f32 %v1335_v10, %v556_v30  ;;  %v462_v33 = vpack.c.bf16 %v448_v29, %v447_v28 }
 0x1d3   :  { %v687_v34 = vmax.f32 %v1357_v31, %v1360_v19  ;;  %595 = vmatmul.bf16.gmra.mxu3 %v462_v33  ;;  %v632_v33 = vadd.s32 200, %v607_v26 }
 0x1d4   :  { %v420_v35 = vpop.f32.mrf.mxu3 }
 0x1d5   :  { %v421_v39 = vadd.f32 %v1301_v32, %v420_v35  ;;  %vm658_vm1 = vcmp.lt.s32.totalorder %v632_v33, 203 }
 0x1d7   :  { %v449_v43 = vmax.f32 %v421_v39, 0.0 }
 0x1d8   :  { %v558_v36 = vpop.f32.mrf.mxu2 }
 0x1d9   :  { %v1368_v38 = vadd.f32 %v1335_v10, %v558_v36 }
 0x1db   :  { %v688_v40 = vmax.f32 %v1365_v37, %v1368_v38 }
 0x1dc   :  { %v422_v41 = vpop.f32.mrf.mxu3 }
 0x1dd   :  { %v423_v42 = vadd.f32 %v1301_v32, %v422_v41 }
 0x1df   :  { %v450_v44 = vmax.f32 %v423_v42, 0.0 }
 0x1e0   :  { %v561_v45 = vpop.f32.mrf.mxu2 }
 0x1e1   :  { %v1375_v46 = vadd.f32 %v1335_v10, %v561_v45  ;;  %v463_v47 = vpack.c.bf16 %v450_v44, %v449_v43 }
 0x1e3   :  { %v689_v48 = vmax.f32 %v685_v18, %v1375_v46  ;;  %600 = vmatmul.bf16.gmra.mxu3 %v463_v47 }
 0x1e8   :  { %v563_v49 = vpop.f32.mrf.mxu2 }
 0x1e9   :  { %v1379_v50 = vadd.f32 %v1335_v10, %v563_v49 }
 0x1eb   :  { %v690_v51 = vmax.f32 %v686_v25, %v1379_v50 }
 0x1f0   :  { %v566_v52 = vpop.f32.mrf.mxu2 }
 0x1f1   :  { %v1383_v53 = vadd.f32 %v1335_v10, %v566_v52 }
 0x1f3   :  { %v691_v32 = vmax.f32 %v687_v34, %v1383_v53 }
 0x1f8   :  { %v568_v54 = vpop.f32.mrf.mxu2 }
 0x1f9   :  { %v1387_v1 = vadd.f32 %v1335_v10, %v568_v54 }
 0x1fb   :  { %v692_v5 = vmax.f32 %v688_v40, %v1387_v1 }
 0x200   :  { %v571_v55 = vpop.f32.mrf.mxu2 }
 0x201   :  { %v1415_v27 = vadd.f32 %v1335_v10, %v571_v55 }
 0x203   :  { %v693_v34 = vmax.f32 %v689_v48, %v1415_v27 }
 0x208   :  { %v573_v56 = vpop.f32.mrf.mxu2 }
 0x209   :  { %v1418_v28 = vadd.f32 %v1335_v10, %v573_v56 }
 0x20b   :  { %v694_v35 = vmax.f32 %v690_v51, %v1418_v28 }
 0x210   :  { %v576_v57 = vpop.f32.mrf.mxu2 }
 0x211   :  { %v1390_v3 = vadd.f32 %v1335_v10, %v576_v57 }
 0x213   :  { %v695_v8 = vmax.f32 %v691_v32, %v1390_v3 }
 0x218   :  { %v578_v58 = vpop.f32.mrf.mxu2 }
 0x219   :  { %v1393_v4 = vadd.f32 %v1335_v10, %v578_v58 }
 0x21b   :  { %v696_v9 = vmax.f32 %v692_v5, %v1393_v4 }
 0x220   :  { %v581_v59 = vpop.f32.mrf.mxu2 }
 0x221   :  { %v1421_v29 = vadd.f32 %v1335_v10, %v581_v59 }
 0x223   :  { %v697_v40 = vmax.f32 %v693_v34, %v1421_v29 }
 0x228   :  { %v583_v60 = vpop.f32.mrf.mxu2 }
 0x229   :  { %v1424_v30 = vadd.f32 %v1335_v10, %v583_v60 }
 0x22b   :  { %v698_v41 = vmax.f32 %v694_v35, %v1424_v30 }
 0x230   :  { %v586_v62 = vpop.f32.mrf.mxu2 }
 0x231   :  { %v1397_v6 = vadd.f32 %v1335_v10, %v586_v62 }
 0x233   :  { %v699_v13 = vmax.f32 %v695_v8, %v1397_v6 }
 0x238   :  { %v588_v2 = vpop.f32.mrf.mxu2 }
 0x239   :  { %v1400_v7 = vadd.f32 %v1335_v10, %v588_v2 }
 0x23b   :  { %v700_v14 = vmax.f32 %v696_v9, %v1400_v7 }
 0x246   :  { %v591_v61 = vpop.f32.mrf.mxu3 }
 0x247   :  { %v1429_v36 = vadd.f32 %v1335_v10, %v591_v61 }
 0x249   :  { %v701_v45 = vmax.f32 %v697_v40, %v1429_v36 }
 0x24e   :  { %v593_v63 = vpop.f32.mrf.mxu3 }
 0x24f   :  { %v1432_v39 = vadd.f32 %v1335_v10, %v593_v63 }
 0x251   :  { %v702_v47 = vmax.f32 %v698_v41, %v1432_v39 }
 0x256   :  { %v596_v0 = vpop.f32.mrf.mxu3 }
 0x257   :  { %v1405_v11 = vadd.f32 %v1335_v10, %v596_v0 }
 0x259   :  { %v703_v18 = vmax.f32 %v699_v13, %v1405_v11 }
 0x25e   :  { %v598_v12 = vpop.f32.mrf.mxu3 }
 0x25f   :  { %v1410_v16 = vadd.f32 %v1335_v10, %v598_v12 }
 0x261   :  { %v704_v20 = vmax.f32 %v700_v14, %v1410_v16 }
 0x263   :  { %v708_v24 = vmax.f32 %v703_v18, %v704_v20 }
 0x266   :  { %v601_v25 = vpop.f32.mrf.mxu3 }
 0x267   :  { %v1437_v42 = vadd.f32 %v1335_v10, %v601_v25 }
 0x269   :  { %v705_v49 = vmax.f32 %v701_v45, %v1437_v42 }
 0x26e   :  { %v603_v43 = vpop.f32.mrf.mxu3 }
 0x26f   :  { %v604_v44 = vadd.f32 %v1335_v10, %v603_v43 }
 0x271   :  { %v1442_v48 = vsel %vm658_vm1, %v604_v44, -1e+30 }
 0x272   :  { %v706_v51 = vmax.f32 %v702_v47, %v1442_v48 }
 0x274   :  { %v707_v52 = vmax.f32 %v705_v49, %v706_v51 }
 0x276   :  { %v709_v32 = vmax.f32 %v707_v52, %v708_v24 }
 0x278   :  { %v710_v54 = vrot.slane %v709_v32, 4 }
 0x27a   :  { %v711_v55 = vmax.f32 %v709_v32, %v710_v54 }
 0x27c   :  { %v712_v56 = vrot.slane %v711_v55, 2 }
 0x27e   :  { %v713_v57 = vmax.f32 %v711_v55, %v712_v56 }
 0x280   :  { %v714_v58 = vrot.slane %v713_v57, 1 }
 0x282   :  { %v1446_v59 = vmax.f32 %v713_v57, %v714_v58 }
 0x284   :  { %v716_v10 = vsub.f32 %v1339_v15, %v1446_v59  ;;  %v717_v60 = vsub.f32 %v1347_v22, %v1446_v59  ;;  %v718_v61 = vsub.f32 %v1357_v31, %v1446_v59  ;;  %v719_v62 = vsub.f32 %v1365_v37, %v1446_v59 }
 0x285   :  { %v720_v63 = vsub.f32 %v1342_v17, %v1446_v59  ;;  %v721_v0 = vsub.f32 %v1350_v23, %v1446_v59  ;;  %v722_v2 = vsub.f32 %v1360_v19, %v1446_v59  ;;  %v723_v15 = vsub.f32 %v1368_v38, %v1446_v59 }
 0x286   :  { %v724_v22 = vsub.f32 %v1375_v46, %v1446_v59  ;;  %v725_v31 = vsub.f32 %v1379_v50, %v1446_v59  ;;  %v726_v37 = vsub.f32 %v1383_v53, %v1446_v59  ;;  %v740_v17 = vsub.f32 %v1437_v42, %v1446_v59 }
 0x287   :  { %v741_v23 = vsub.f32 %v1442_v48, %v1446_v59  ;;  %v742_v5 = vmul.f32 1.442695, %v716_v10  ;;  %v744_v19 = vmul.f32 1.442695, %v717_v60  ;;  %v746_v8 = vmul.f32 1.442695, %v718_v61 }
 0x288   :  { %v748_v38 = vmul.f32 1.442695, %v719_v62  ;;  %v750_v46 = vmul.f32 1.442695, %v720_v63  ;;  %v752_v9 = vmul.f32 1.442695, %v721_v0  ;;  %v727_v33 = vsub.f32 %v1387_v1, %v1446_v59 }
 0x289   :  { %1078 = vpow2.f32 %v742_v5  ;;  %v754_v53 = vmul.f32 1.442695, %v722_v2  ;;  %v756_v18 = vmul.f32 1.442695, %v723_v15  ;;  %v758_v24 = vmul.f32 1.442695, %v724_v22 }
 0x28a   :  { %1080 = vpow2.f32 %v744_v19  ;;  %v760_v34 = vmul.f32 1.442695, %v725_v31  ;;  %v728_v41 = vsub.f32 %v1415_v27, %v1446_v59  ;;  %v762_v43 = vmul.f32 1.442695, %v726_v37 }
 0x28b   :  { %1082 = vpow2.f32 %v746_v8  ;;  %v729_v47 = vsub.f32 %v1418_v28, %v1446_v59  ;;  %v764_v1 = vmul.f32 1.442695, %v727_v33  ;;  %v730_v52 = vsub.f32 %v1390_v3, %v1446_v59 }
 0x28c   :  { %1084 = vpow2.f32 %v748_v38  ;;  %v766_v27 = vmul.f32 1.442695, %v728_v41  ;;  %v731_v55 = vsub.f32 %v1393_v4, %v1446_v59  ;;  %v732_v58 = vsub.f32 %v1421_v29, %v1446_v59 }
 0x28d   :  { %1086 = vpow2.f32 %v750_v46  ;;  %v768_v28 = vmul.f32 1.442695, %v729_v47  ;;  %v770_v3 = vmul.f32 1.442695, %v730_v52  ;;  %v733_v61 = vsub.f32 %v1424_v30, %v1446_v59 }
 0x28e   :  { %1088 = vpow2.f32 %v752_v9  ;;  %v772_v4 = vmul.f32 1.442695, %v731_v55  ;;  %v734_v0 = vsub.f32 %v1397_v6, %v1446_v59  ;;  %v774_v29 = vmul.f32 1.442695, %v732_v58 }
 0x28f   :  { %v1474_v50 = vpop.eup %1078  ;;  %1090 = vpow2.f32 %v754_v53  ;;  %v735_v22 = vsub.f32 %v1400_v7, %v1446_v59  ;;  %v776_v30 = vmul.f32 1.442695, %v733_v61  ;;  %v736_v5 = vsub.f32 %v1429_v36, %v1446_v59 }
 0x290   :  { %v1476_v12 = vpop.eup %1080  ;;  %1092 = vpow2.f32 %v756_v18  ;;  %v778_v6 = vmul.f32 1.442695, %v734_v0  ;;  %v737_v38 = vsub.f32 %v1432_v39, %v1446_v59  ;;  %v738_v53 = vsub.f32 %v1405_v11, %v1446_v59 }
 0x291   :  { %v794_v13 = vadd.f32 %v1476_v12, %v1474_v50  ;;  %v1480_v14 = vpop.eup %1082  ;;  %1094 = vpow2.f32 %v758_v24  ;;  %v780_v7 = vmul.f32 1.442695, %v735_v22  ;;  %v782_v36 = vmul.f32 1.442695, %v736_v5 }
 0x292   :  { %v1483_v21 = vpop.eup %1084  ;;  %1096 = vpow2.f32 %v760_v34  ;;  %v784_v39 = vmul.f32 1.442695, %v737_v38  ;;  %v786_v33 = vmul.f32 1.442695, %v738_v53 }
 0x293   :  { %v795_v20 = vadd.f32 %v1480_v14, %v794_v13  ;;  %v1486_v26 = vpop.eup %1086  ;;  %1098 = vpow2.f32 %v762_v43 }
 0x294   :  { %v1491_v40 = vpop.eup %1088  ;;  %1100 = vpow2.f32 %v764_v1  ;;  %v792_v1 = vmul.f32 1.442695, %v741_v23 }
 0x295   :  { %v796_v25 = vadd.f32 %v1483_v21, %v795_v20  ;;  %v1496_v45 = vpop.eup %1090  ;;  %1102 = vpow2.f32 %v766_v27  ;;  %v739_v20 = vsub.f32 %v1410_v16, %v1446_v59  ;;  %v790_v16 = vmul.f32 1.442695, %v740_v17 }
 0x296   :  { %v1501_v51 = vpop.eup %1092  ;;  %1104 = vpow2.f32 %v768_v28 }
 0x297   :  { %v797_v35 = vadd.f32 %v1486_v26, %v796_v25  ;;  %v1506_v54 = vpop.eup %1094  ;;  %1106 = vpow2.f32 %v770_v3 }
 0x298   :  { %v1511_v57 = vpop.eup %1096  ;;  %1108 = vpow2.f32 %v772_v4 }
 0x299   :  { %v798_v44 = vadd.f32 %v1491_v40, %v797_v35  ;;  %v1516_v60 = vpop.eup %1098  ;;  %1110 = vpow2.f32 %v774_v29  ;;  %v788_v35 = vmul.f32 1.442695, %v739_v20 }
 0x29a   :  { %v1521_v63 = vpop.eup %1100  ;;  %1112 = vpow2.f32 %v776_v30 }
 0x29b   :  { %v799_v49 = vadd.f32 %v1496_v45, %v798_v44  ;;  %v1526_v15 = vpop.eup %1102  ;;  %1114 = vpow2.f32 %v778_v6 }
 0x29c   :  { %v1531_v37 = vpop.eup %1104  ;;  %1116 = vpow2.f32 %v780_v7 }
 0x29d   :  { %v800_v32 = vadd.f32 %v1501_v51, %v799_v49  ;;  %v1536_v8 = vpop.eup %1106  ;;  %1118 = vpow2.f32 %v782_v36 }
 0x29e   :  { %v1541_v9 = vpop.eup %1108  ;;  %1120 = vpow2.f32 %v784_v39 }
 0x29f   :  { %v801_v56 = vadd.f32 %v1506_v54, %v800_v32  ;;  %v1546_v18 = vpop.eup %1110  ;;  %1122 = vpow2.f32 %v786_v33 }
 0x2a0   :  { %v1551_v25 = vpop.eup %1112  ;;  %1124 = vpow2.f32 %v788_v35 }
 0x2a1   :  { %v802_v10 = vadd.f32 %v1511_v57, %v801_v56  ;;  %v1554_v11 = vpop.eup %1114  ;;  %1126 = vpow2.f32 %v790_v16 }
 0x2a2   :  { %v1117_v43 = vpop.eup %1116  ;;  %1128 = vpow2.f32 %v792_v1 }
 0x2a3   :  { %v803_v62 = vadd.f32 %v1516_v60, %v802_v10  ;;  %v1119_v47 = vpop.eup %1118 }
 0x2a4   :  { %v1121_v52 = vpop.eup %1120 }
 0x2a5   :  { %v804_v2 = vadd.f32 %v1521_v63, %v803_v62  ;;  %v1123_v32 = vpop.eup %1122 }
 0x2a6   :  { %v1125_v28 = vpop.eup %1124 }
 0x2a7   :  { %v805_v31 = vadd.f32 %v1526_v15, %v804_v2  ;;  %v1127_v58 = vpop.eup %1126 }
 0x2a8   :  { %v1129_v42 = vpop.eup %1128 }
 0x2a9   :  { %v806_v19 = vadd.f32 %v1531_v37, %v805_v31 }
 0x2ab   :  { %v807_v46 = vadd.f32 %v1536_v8, %v806_v19 }
 0x2ad   :  { %v808_v13 = vadd.f32 %v1541_v9, %v807_v46 }
 0x2af   :  { %v809_v24 = vadd.f32 %v1546_v18, %v808_v13 }
 0x2b1   :  { %v810_v34 = vadd.f32 %v1551_v25, %v809_v24 }
 0x2b3   :  { %v811_v41 = vadd.f32 %v1554_v11, %v810_v34 }
 0x2b5   :  { %v812_v44 = vadd.f32 %v1117_v43, %v811_v41 }
 0x2b7   :  { %v813_v49 = vadd.f32 %v1119_v47, %v812_v44 }
 0x2b9   :  { %v814_v27 = vadd.f32 %v1121_v52, %v813_v49 }
 0x2bb   :  { %v815_v55 = vadd.f32 %v1123_v32, %v814_v27 }
 0x2bd   :  { %v816_v56 = vadd.f32 %v1125_v28, %v815_v55 }
 0x2bf   :  { %v817_v3 = vadd.f32 %v1127_v58, %v816_v56 }
 0x2c1   :  { %v818_v17 = vadd.f32 %v1129_v42, %v817_v3 }
 0x2c3   :  { %v819_v10 = vrot.slane %v818_v17, 4 }
 0x2c5   :  { %v820_v61 = vadd.f32 %v819_v10, %v818_v17 }
 0x2c7   :  { %v821_v4 = vrot.slane %v820_v61, 2 }
 0x2c9   :  { %v822_v62 = vadd.f32 %v821_v4, %v820_v61 }
 0x2cb   :  { %v823_v0 = vrot.slane %v822_v62, 1 }
 0x2cd   :  { %v824_v48 = vadd.f32 %v823_v0, %v822_v62 }
 0x2cf   :  { %1130 = vrcp.f32 %v824_v48  ;;  %v836_v2 = vand.u32 2147483648, %v824_v48  ;;  %v834_v30 = vand.u32 2147483647, %v824_v48  ;;  %vm830_vm3 = vweird.f32 %v824_v48 }
 0x2d1   :  { %v837_v5 = vor.u32 1.1754944e-38, %v836_v2  ;;  %vm835_vm5 = vcmp.eq.f32.partialorder %v834_v30, 8.507059e+37 }
 0x2d5   :  { %v1131_v59 = vpop.eup %1130 }
 0x2d6   :  { %v826_v23 = vmul.f32 %v1131_v59, %v824_v48  ;;  %vm831_vm2 = vweird.f32 %v1131_v59 }
 0x2d7   :  { %vm832_vm4 = vmor %vm830_vm3, %vm831_vm2 }
 0x2d8   :  { %v827_v29 = vsub.f32 1.0, %v826_v23 }
 0x2da   :  { %v828_v22 = vmul.f32 %v1131_v59, %v827_v29 }
 0x2dc   :  { %v829_v31 = vadd.f32 %v1131_v59, %v828_v22 }
 0x2de   :  { %v833_v6 = vsel %vm832_vm4, %v1131_v59, %v829_v31 }
 0x2df   :  { %v838_v19 = vsel %vm835_vm5, %v837_v5, %v833_v6 }
 0x2e0   :  { %v839_v38 = vmul.f32 %v1474_v50, %v838_v19  ;;  %v840_v7 = vmul.f32 %v1476_v12, %v838_v19  ;;  %v841_v46 = vmul.f32 %v1480_v14, %v838_v19  ;;  %v842_v53 = vmul.f32 %v1483_v21, %v838_v19 }
 0x2e1   :  { %v843_v36 = vmul.f32 %v1486_v26, %v838_v19  ;;  %v844_v13 = vmul.f32 %v1491_v40, %v838_v19  ;;  %v845_v20 = vmul.f32 %v1496_v45, %v838_v19  ;;  %v846_v39 = vmul.f32 %v1501_v51, %v838_v19 }
 0x2e2   :  { %v849_v24 = vmul.f32 %v1516_v60, %v838_v19  ;;  %v850_v33 = vmul.f32 %v1521_v63, %v838_v19  ;;  %865 = vst [vmem:[%s1667_s7] sm:$0xff] %v839_v38  ;;  %v851_v50 = vmul.f32 %v1526_v15, %v838_v19  ;;  %v852_v12 = vmul.f32 %v1531_v37, %v838_v19 }
 0x2e3   :  { %v853_v14 = vmul.f32 %v1536_v8, %v838_v19  ;;  %v854_v21 = vmul.f32 %v1541_v9, %v838_v19  ;;  %866 = vst [vmem:[%s1667_s7 + $0x8] sm:$0xff] %v840_v7  ;;  %v855_v26 = vmul.f32 %v1546_v18, %v838_v19  ;;  %v856_v40 = vmul.f32 %v1551_v25, %v838_v19 }
 0x2e4   :  { %v857_v45 = vmul.f32 %v1554_v11, %v838_v19  ;;  %v858_v51 = vmul.f32 %v1117_v43, %v838_v19  ;;  %867 = vst [vmem:[%s1667_s7 + $0x10] sm:$0xff] %v841_v46  ;;  %v859_v60 = vmul.f32 %v1119_v47, %v838_v19  ;;  %v860_v63 = vmul.f32 %v1121_v52, %v838_v19 }
 0x2e5   :  { %v861_v15 = vmul.f32 %v1123_v32, %v838_v19  ;;  %v862_v37 = vmul.f32 %v1125_v28, %v838_v19  ;;  %868 = vst [vmem:[%s1667_s7 + $0x18] sm:$0xff] %v842_v53  ;;  %v847_v8 = vmul.f32 %v1506_v54, %v838_v19  ;;  %v863_v9 = vmul.f32 %v1127_v58, %v838_v19 }
 0x2e6   :  { %v864_v18 = vmul.f32 %v1129_v42, %v838_v19  ;;  %869 = vst [vmem:[%s1667_s7 + $0x20] sm:$0xff] %v843_v36  ;;  %v848_v25 = vmul.f32 %v1511_v57, %v838_v19 }
 0x2e7   :  { %870 = vst [vmem:[%s1667_s7 + $0x28] sm:$0xff] %v844_v13 }
 0x2e8   :  { %871 = vst [vmem:[%s1667_s7 + $0x30] sm:$0xff] %v845_v20 }
 0x2e9   :  { %872 = vst [vmem:[%s1667_s7 + $0x38] sm:$0xff] %v846_v39 }
 0x2ea   :  { %873 = vst [vmem:[%s1667_s7 + $0x40] sm:$0xff] %v847_v8 }
 0x2eb   :  { %874 = vst [vmem:[%s1667_s7 + $0x48] sm:$0xff] %v848_v25 }
 0x2ec   :  { %875 = vst [vmem:[%s1667_s7 + $0x50] sm:$0xff] %v849_v24 }
 0x2ed   :  { %876 = vst [vmem:[%s1667_s7 + $0x58] sm:$0xff] %v850_v33 }
 0x2ee   :  { %877 = vst [vmem:[%s1667_s7 + $0x60] sm:$0xff] %v851_v50 }
 0x2ef   :  { %878 = vst [vmem:[%s1667_s7 + $0x68] sm:$0xff] %v852_v12 }
 0x2f0   :  { %879 = vst [vmem:[%s1667_s7 + $0x70] sm:$0xff] %v853_v14 }
 0x2f1   :  { %880 = vst [vmem:[%s1667_s7 + $0x78] sm:$0xff] %v854_v21 }
 0x2f2   :  { %881 = vst [vmem:[%s1667_s7 + $0x80] sm:$0xff] %v855_v26 }
 0x2f3   :  { %882 = vst [vmem:[%s1667_s7 + $0x88] sm:$0xff] %v856_v40 }
 0x2f4   :  { %883 = vst [vmem:[%s1667_s7 + $0x90] sm:$0xff] %v857_v45 }
 0x2f5   :  { %884 = vst [vmem:[%s1667_s7 + $0x98] sm:$0xff] %v858_v51 }
 0x2f6   :  { %885 = vst [vmem:[%s1667_s7 + $0xa0] sm:$0xff] %v859_v60 }
 0x2f7   :  { %886 = vst [vmem:[%s1667_s7 + $0xa8] sm:$0xff] %v860_v63 }
 0x2f8   :  { %887 = vst [vmem:[%s1667_s7 + $0xb0] sm:$0xff] %v861_v15 }
 0x2f9   :  { %888 = vst [vmem:[%s1667_s7 + $0xb8] sm:$0xff] %v862_v37 }
 0x2fa   :  { %889 = vst [vmem:[%s1667_s7 + $0xc0] sm:$0xff] %v863_v9 }
 0x2fb   :  { %890 = vst [vmem:[%s1667_s7 + $0xc8] sm:$0xff] %v864_v18 }

</bundles_post_ra>
